<compile_context>
chip_gen: v7x
topology: tpu7x:2x2x1
jax: 0.10.0
libtpu: 0.0.40
codegen_flags: <defaults>
</compile_context>

<pallas_src>
import functools

import jax
import jax.numpy as jnp
from jax.experimental import pallas as pl
from jax.experimental.pallas import tpu as pltpu

NEG_INF = -1e30


def gat_kernel(wx1_ref, s_s_ref, s_t_ref, tgt_ref, src_ref, out_ref,
               a_acc_ref, *, tile_e):
    """One (node-row tile i, edge tile k) grid step."""
    i = pl.program_id(0)
    k = pl.program_id(1)
    k_last = pl.num_programs(1) - 1

    tile_n, n_nodes = a_acc_ref.shape
    row_off = i * tile_n
    e_off = pl.multiple_of(k * tile_e, tile_e)

    @pl.when(k == 0)
    def _init():
        a_acc_ref[...] = jnp.zeros_like(a_acc_ref)

    # ---- Edge-count adjacency accumulation on the MXU (bf16 one-hots exact) --
    # Edge list is fully resident in VMEM; slice the current edge tile in-kernel
    # (no per-(i, k) edge DMA).  One-hots are built directly in the layouts the
    # matmul needs (targets node-major, sources edge-major), so no transposes.
    tgt_tile = tgt_ref[:, pl.ds(e_off, tile_e)]                    # [1, tile_e]
    src_tile = src_ref[pl.ds(e_off, tile_e), :]                    # [tile_e, 1]
    row_ids = jax.lax.broadcasted_iota(jnp.int32, (tile_n, tile_e), 0) + row_off
    t_onehot = (row_ids == tgt_tile).astype(jnp.bfloat16)          # [tile_n, tile_e]
    col_ids = jax.lax.broadcasted_iota(jnp.int32, (tile_e, n_nodes), 1)
    s_onehot = (col_ids == src_tile).astype(jnp.bfloat16)          # [tile_e, N]
    a_acc_ref[...] += jnp.dot(t_onehot, s_onehot,
                              preferred_element_type=jnp.float32)  # [tile_n, N]

    @pl.when(k == k_last)
    def _finalize():
        # Attention logits from the hoisted per-node scalars (no matmuls here).
        e = s_t_ref[...] + s_s_ref[...]                            # [tile_n, N]
        e = jnp.where(e > 0, e, 0.2 * e)                           # LeakyReLU(0.2)

        counts = a_acc_ref[...]                                    # [tile_n, N]
        # Mask non-edge columns *before* the exp so an overflowing masked
        # column can never poison a row (exp(NEG_INF - max) underflows to 0).
        e_masked = jnp.where(counts > 0.0, e, NEG_INF)
        row_max = jnp.max(e_masked, axis=1, keepdims=True)         # [tile_n, 1]
        # Multiplicity-weighted softmax (duplicate / absent edges handled
        # exactly by the integer edge counts); reuse the masked-logit slab for
        # the exp and consume `counts` immediately to keep the live
        # [tile_n, N] slab count low at large tile_n.
        p = jnp.exp(e_masked - row_max) * counts                   # [tile_n, N]
        den = jnp.sum(p, axis=1, keepdims=True)                    # [tile_n, 1]
        w = p * pl.reciprocal(den, approx=False)                   # exact: 1e-4 tol
        out_ref[...] = jnp.dot(w, wx1_ref[...],
                               preferred_element_type=jnp.float32)  # [tile_n, H]


def _choose_tile_n(n_nodes, vmem_budget_bytes):
    """Largest row tile (<=256, multiple of 8, divides N) whose [tile_n, N]
    adjacency + epilogue slabs (~3x f32) fit inside the VMEM budget."""
    cap = max(8, vmem_budget_bytes // (3 * 4 * n_nodes))
    tile_n = min(256, n_nodes, cap)
    tile_n = max(8, (tile_n // 8) * 8)
    while tile_n > 8 and n_nodes % tile_n != 0:
        tile_n -= 8
    if n_nodes % tile_n != 0:
        tile_n = n_nodes                 # full-extent block is always legal
    return tile_n


def gat_conv_pallas(x, edge_index, w1, w2, a_s, a_t, *,
                    tile_n=None, tile_e=256,
                    vmem_budget_bytes=24 * 1024 * 1024):
    """x: [N, D] f32; edge_index: [2, E] int; w1, w2: [H, D]; a_s, a_t: [1, H]."""
    N, D = x.shape
    H = w1.shape[0]

    if tile_n is None:
        # Size the row tile from a VMEM budget (re-derive per TPU generation:
        # v5e/v6e have 128 MiB VMEM, v7x only 64 MiB per TensorCore).  The
        # default budget stays under every generation's default scoped limit.
        tile_n = _choose_tile_n(N, vmem_budget_bytes)
    assert N % tile_n == 0, "tile_n must divide N"
    assert tile_n % 8 == 0 or tile_n == N, "tile_n must be a multiple of 8"

    # ---- Node-level feature math hoisted out of the kernel (i-invariant) ----
    #   wx1[j] = w1 x_j                  (source feature transform)
    #   s_t[i] = a_s . (w2 x_i)          (target attention scalar, tiled by row)
    #   s_s[j] = a_t . (w1 x_j)          (source attention scalar, lane-dense)
    wx1 = jnp.dot(x, w1.T)                                # [N, H]
    s_t = jnp.dot(x, (a_s @ w2).T)                        # [N, 1]
    s_s = jnp.dot(x, (a_t @ w1).T).T                      # [1, N]

    # Append self loops (matches the PyTorch module).
    loop = jnp.arange(N, dtype=jnp.int32)
    src = jnp.concatenate([edge_index[0].astype(jnp.int32), loop])
    tgt = jnp.concatenate([edge_index[1].astype(jnp.int32), loop])
    e_total = src.shape[0]

    # Pad the edge list to a multiple of the edge tile with sentinel id N
    # (matches no node, so padded edges contribute nothing).  Shrink tile_e for
    # tiny graphs so we don't scan mostly-padding tiles.
    tile_e = max(128, min(tile_e, pl.cdiv(e_total, 128) * 128))
    e_pad = pl.cdiv(e_total, tile_e) * tile_e
    pad = e_pad - e_total
    src = jnp.concatenate([src, jnp.full((pad,), N, jnp.int32)])
    tgt = jnp.concatenate([tgt, jnp.full((pad,), N, jnp.int32)])
    src_col = src[:, None]                # [e_pad, 1]  sublane-major (S one-hot)
    tgt_row = tgt[None, :]                # [1, e_pad]  lane-major    (T one-hot)

    grid = (N // tile_n, e_pad // tile_e)
    kernel = functools.partial(gat_kernel, tile_e=tile_e)

    return pl.pallas_call(
        kernel,
        out_shape=jax.ShapeDtypeStruct((N, H), jnp.float32),
        grid=grid,
        in_specs=[
            pl.BlockSpec((N, H), lambda i, k: (0, 0)),          # wx1 (resident)
            pl.BlockSpec((1, N), lambda i, k: (0, 0)),          # s_s (resident)
            pl.BlockSpec((tile_n, 1), lambda i, k: (i, 0)),     # s_t row tile
            pl.BlockSpec((1, e_pad), lambda i, k: (0, 0)),      # tgt (resident)
            pl.BlockSpec((e_pad, 1), lambda i, k: (0, 0)),      # src (resident)
        ],
        out_specs=pl.BlockSpec((tile_n, H), lambda i, k: (i, 0)),
        scratch_shapes=[pltpu.VMEM((tile_n, N), jnp.float32)],
        compiler_params=pltpu.CompilerParams(
            dimension_semantics=("parallel", "arbitrary")),
    )(wx1, s_s, s_t, tgt_row, src_col)


def gat_conv_ref(x, edge_index, w1, w2, a_s, a_t):
    """Pure-JAX reference matching the PyTorch forward."""
    N = x.shape[0]
    self_loop = jnp.stack([jnp.arange(N, dtype=jnp.int32),
                           jnp.arange(N, dtype=jnp.int32)], axis=0)
    ei = jnp.concatenate([edge_index.astype(jnp.int32), self_loop], axis=1)
    src, tgt = ei[0], ei[1]
    x_j, x_i = x[src], x[tgt]
    wx_j = x_j @ w1.T
    wx_i = x_i @ w2.T
    e = jax.nn.leaky_relu((a_s * wx_i).sum(-1) + (a_t * wx_j).sum(-1), 0.2)
    max_per = jax.ops.segment_max(e, tgt, num_segments=N)
    e_exp = jnp.exp(e - max_per[tgt])
    denom = jax.ops.segment_sum(e_exp, tgt, num_segments=N)
    alpha = e_exp / denom[tgt]
    return jax.ops.segment_sum(wx_j * alpha[:, None], tgt, num_segments=N)


if __name__ == "__main__":
    N, node_dim, hidden_dim, E = 16, 32, 32, 48

    key = jax.random.PRNGKey(0)
    k_x, k_e, k_w1, k_w2, k_as, k_at = jax.random.split(key, 6)

    x = jax.random.normal(k_x, (N, node_dim), dtype=jnp.float32)
    edge_index = jax.random.randint(k_e, (2, E), 0, N, dtype=jnp.int32)

    # Deterministic parameter init (Xavier-style uniform scales).
    lim_w = (6.0 / (node_dim + hidden_dim)) ** 0.5
    w1 = jax.random.uniform(k_w1, (hidden_dim, node_dim), jnp.float32, -lim_w, lim_w)
    w2 = jax.random.uniform(k_w2, (hidden_dim, node_dim), jnp.float32, -lim_w, lim_w)
    lim_a = (6.0 / (1 + hidden_dim)) ** 0.5
    a_s = jax.random.uniform(k_as, (1, hidden_dim), jnp.float32, -lim_a, lim_a)
    a_t = jax.random.uniform(k_at, (1, hidden_dim), jnp.float32, -lim_a, lim_a)

    out = gat_conv_pallas(x, edge_index, w1, w2, a_s, a_t)
    out = jax.block_until_ready(out)

    ref = jax.block_until_ready(gat_conv_ref(x, edge_index, w1, w2, a_s, a_t))
    assert out.shape == (N, hidden_dim)
    assert jnp.allclose(out, ref, atol=1e-4, rtol=1e-4), "mismatch vs reference"

    print("KERNEL_OK")
</pallas_src>

<mosaic_0001>
module attributes {stable_mosaic.version = 11 : i64} {
  func.func @gat_kernel(%arg0: i32, %arg1: i32, %arg2: memref<16x32xf32, #tpu.memory_space<vmem>>, %arg3: memref<1x16xf32, #tpu.memory_space<vmem>>, %arg4: memref<16x1xf32, #tpu.memory_space<vmem>>, %arg5: memref<1x128xi32, #tpu.memory_space<vmem>>, %arg6: memref<128x1xi32, #tpu.memory_space<vmem>>, %arg7: memref<16x32xf32, #tpu.memory_space<vmem>>, %arg8: memref<16x16xf32, #tpu.memory_space<vmem>>) attributes {dimension_semantics = [#tpu.dimension_semantics<parallel>, #tpu.dimension_semantics<arbitrary>], iteration_bounds = array<i64: 1, 1>, scalar_prefetch = 0 : i64, scratch_operands = 1 : i64, tpu.core_type = #tpu.core_type<tc>, window_params = [{pipeline_mode = #tpu.pipeline_mode<synchronous>, transform_indices = @transform_0, window_bounds = array<i64: 16, 32>}, {pipeline_mode = #tpu.pipeline_mode<synchronous>, transform_indices = @transform_1, window_bounds = array<i64: 1, 16>}, {transform_indices = @transform_2, window_bounds = array<i64: 16, 1>}, {pipeline_mode = #tpu.pipeline_mode<synchronous>, transform_indices = @transform_3, window_bounds = array<i64: 1, 128>}, {pipeline_mode = #tpu.pipeline_mode<synchronous>, transform_indices = @transform_4, window_bounds = array<i64: 128, 1>}, {transform_indices = @transform_5, window_bounds = array<i64: 16, 32>}]} {
    %c16_i32 = arith.constant 16 : i32
    %0 = arith.muli %arg0, %c16_i32 : i32
    %c128_i32 = arith.constant 128 : i32
    %1 = arith.muli %arg1, %c128_i32 : i32
    %2 = tpu.assume_multiple %1, 128 : i32
    %c0_i32 = arith.constant 0 : i32
    %3 = arith.cmpi eq, %arg1, %c0_i32 : i32
    %4 = arith.extui %3 : i1 to i32
    %c0_i32_0 = arith.constant 0 : i32
    %5 = arith.cmpi ne, %4, %c0_i32_0 : i32
    scf.if %5 {
      %cst_8 = arith.constant 0.000000e+00 : f32
      %31 = vector.broadcast %cst_8 : f32 to vector<16x16xf32>
      %c0_9 = arith.constant 0 : index
      %c0_10 = arith.constant 0 : index
      %32 = vector.load %arg8[%c0_9, %c0_10] : memref<16x16xf32, #tpu.memory_space<vmem>>, vector<16x16xf32>
      tpu.vector_store %arg8[%c0_9, %c0_10], %31 {strides = array<i32>} : memref<16x16xf32, #tpu.memory_space<vmem>>, vector<16x16xf32>,
    } else {
    }
    %c0 = arith.constant 0 : index
    %6 = arith.index_cast %2 : i32 to index
    %7 = vector.load %arg5[%c0, %6] : memref<1x128xi32, #tpu.memory_space<vmem>>, vector<1x128xi32>
    %8 = arith.index_cast %2 : i32 to index
    %c0_1 = arith.constant 0 : index
    %9 = vector.load %arg6[%8, %c0_1] : memref<128x1xi32, #tpu.memory_space<vmem>>, vector<128x1xi32>
    %10 = tpu.iota {dimensions = array<i32: 0>} : vector<16x128xi32>
    %11 = vector.broadcast %0 : i32 to vector<16x128xi32>
    %12 = arith.addi %10, %11 : vector<16x128xi32>
    %13 = vector.broadcast %7 : vector<1x128xi32> to vector<16x128xi32>
    %14 = arith.cmpi eq, %12, %13 : vector<16x128xi32>
    %15 = arith.extui %14 : vector<16x128xi1> to vector<16x128xi32>
    %16 = arith.sitofp %15 : vector<16x128xi32> to vector<16x128xf32>
    %17 = arith.truncf %16 : vector<16x128xf32> to vector<16x128xbf16>
    %18 = tpu.iota {dimensions = array<i32: 1>} : vector<128x16xi32>
    %19 = vector.broadcast %9 : vector<128x1xi32> to vector<128x16xi32>
    %20 = arith.cmpi eq, %18, %19 : vector<128x16xi32>
    %21 = arith.extui %20 : vector<128x16xi1> to vector<128x16xi32>
    %22 = arith.sitofp %21 : vector<128x16xi32> to vector<128x16xf32>
    %23 = arith.truncf %22 : vector<128x16xf32> to vector<128x16xbf16>
    %c0_2 = arith.constant 0 : index
    %c0_3 = arith.constant 0 : index
    %24 = vector.load %arg8[%c0_2, %c0_3] : memref<16x16xf32, #tpu.memory_space<vmem>>, vector<16x16xf32>
    %cst = arith.constant dense<0.000000e+00> : vector<16x16xf32>
    %25 = tpu.matmul %17, %23, %cst {dimension_numbers = #tpu.dot_dimension_numbers<[1], [0], [0], [1], [0, 0, 1, 1], [], []>} : vector<16x128xbf16>, vector<128x16xbf16>, vector<16x16xf32> -> vector<16x16xf32>
    %26 = arith.addf %24, %25 : vector<16x16xf32>
    %c0_4 = arith.constant 0 : index
    %c0_5 = arith.constant 0 : index
    %27 = vector.load %arg8[%c0_4, %c0_5] : memref<16x16xf32, #tpu.memory_space<vmem>>, vector<16x16xf32>
    tpu.vector_store %arg8[%c0_4, %c0_5], %26 {strides = array<i32>} : memref<16x16xf32, #tpu.memory_space<vmem>>, vector<16x16xf32>,
    %c0_i32_6 = arith.constant 0 : i32
    %28 = arith.cmpi eq, %arg1, %c0_i32_6 : i32
    %29 = arith.extui %28 : i1 to i32
    %c0_i32_7 = arith.constant 0 : i32
    %30 = arith.cmpi ne, %29, %c0_i32_7 : i32
    scf.if %30 {
      %c0_8 = arith.constant 0 : index
      %c0_9 = arith.constant 0 : index
      %31 = vector.load %arg4[%c0_8, %c0_9] : memref<16x1xf32, #tpu.memory_space<vmem>>, vector<16x1xf32>
      %c0_10 = arith.constant 0 : index
      %c0_11 = arith.constant 0 : index
      %32 = vector.load %arg3[%c0_10, %c0_11] : memref<1x16xf32, #tpu.memory_space<vmem>>, vector<1x16xf32>
      %33 = vector.broadcast %31 : vector<16x1xf32> to vector<16x16xf32>
      %34 = vector.broadcast %32 : vector<1x16xf32> to vector<16x16xf32>
      %35 = arith.addf %33, %34 : vector<16x16xf32>
      %cst_12 = arith.constant 0.000000e+00 : f32
      %36 = vector.broadcast %cst_12 : f32 to vector<16x16xf32>
      %37 = arith.cmpf ogt, %35, %36 : vector<16x16xf32>
      %cst_13 = arith.constant 2.000000e-01 : f32
      %38 = vector.broadcast %cst_13 : f32 to vector<16x16xf32>
      %39 = arith.mulf %38, %35 : vector<16x16xf32>
      %40 = arith.select %37, %35, %39 : vector<16x16xi1>, vector<16x16xf32>
      %c0_14 = arith.constant 0 : index
      %c0_15 = arith.constant 0 : index
      %41 = vector.load %arg8[%c0_14, %c0_15] : memref<16x16xf32, #tpu.memory_space<vmem>>, vector<16x16xf32>
      %cst_16 = arith.constant 0.000000e+00 : f32
      %42 = vector.broadcast %cst_16 : f32 to vector<16x16xf32>
      %43 = arith.cmpf ogt, %41, %42 : vector<16x16xf32>
      %cst_17 = arith.constant -1.000000e+30 : f32
      %44 = vector.broadcast %cst_17 : f32 to vector<16x16xf32>
      %45 = arith.select %43, %40, %44 : vector<16x16xi1>, vector<16x16xf32>
      %cst_18 = arith.constant dense<0xFF800000> : vector<16xf32>
      %46 = vector.multi_reduction <maximumf>, %45, %cst_18 [1] : vector<16x16xf32> to vector<16xf32>
      %47 = vector.shape_cast %46 : vector<16xf32> to vector<16x1xf32>
      %48 = vector.broadcast %47 : vector<16x1xf32> to vector<16x16xf32>
      %49 = arith.subf %45, %48 : vector<16x16xf32>
      %50 = math.exp %49 : vector<16x16xf32>
      %51 = arith.mulf %50, %41 : vector<16x16xf32>
      %cst_19 = arith.constant dense<0.000000e+00> : vector<16xf32>
      %52 = vector.multi_reduction <add>, %51, %cst_19 [1] : vector<16x16xf32> to vector<16xf32>
      %53 = vector.shape_cast %52 : vector<16xf32> to vector<16x1xf32>
      %54 = tpu.reciprocal %53 : vector<16x1xf32> -> vector<16x1xf32>
      %55 = vector.broadcast %54 : vector<16x1xf32> to vector<16x16xf32>
      %56 = arith.mulf %51, %55 : vector<16x16xf32>
      %c0_20 = arith.constant 0 : index
      %c0_21 = arith.constant 0 : index
      %57 = vector.load %arg2[%c0_20, %c0_21] : memref<16x32xf32, #tpu.memory_space<vmem>>, vector<16x32xf32>
      %cst_22 = arith.constant dense<0.000000e+00> : vector<16x32xf32>
      %58 = tpu.matmul %56, %57, %cst_22 {dimension_numbers = #tpu.dot_dimension_numbers<[1], [0], [0], [1], [0, 0, 1, 1], [], []>} : vector<16x16xf32>, vector<16x32xf32>, vector<16x32xf32> -> vector<16x32xf32>
      %c0_23 = arith.constant 0 : index
      %c0_24 = arith.constant 0 : index
      %59 = vector.load %arg7[%c0_23, %c0_24] : memref<16x32xf32, #tpu.memory_space<vmem>>, vector<16x32xf32>
      tpu.vector_store %arg7[%c0_23, %c0_24], %58 {strides = array<i32>} : memref<16x32xf32, #tpu.memory_space<vmem>>, vector<16x32xf32>,
    } else {
    }
    return
  }
  func.func @transform_0(%arg0: i32, %arg1: i32) -> (i32, i32) {
    %c0_i32 = arith.constant 0 : i32
    %c0_i32_0 = arith.constant 0 : i32
    %c0_i32_1 = arith.constant 0 : i32
    return %c0_i32, %c0_i32_0 : i32, i32
  }
  func.func @transform_1(%arg0: i32, %arg1: i32) -> (i32, i32) {
    %c0_i32 = arith.constant 0 : i32
    %c0_i32_0 = arith.constant 0 : i32
    %c0_i32_1 = arith.constant 0 : i32
    return %c0_i32, %c0_i32_0 : i32, i32
  }
  func.func @transform_2(%arg0: i32, %arg1: i32) -> (i32, i32) {
    %c0_i32 = arith.constant 0 : i32
    %c0_i32_0 = arith.constant 0 : i32
    return %arg0, %c0_i32 : i32, i32
  }
  func.func @transform_3(%arg0: i32, %arg1: i32) -> (i32, i32) {
    %c0_i32 = arith.constant 0 : i32
    %c0_i32_0 = arith.constant 0 : i32
    %c0_i32_1 = arith.constant 0 : i32
    return %c0_i32, %c0_i32_0 : i32, i32
  }
  func.func @transform_4(%arg0: i32, %arg1: i32) -> (i32, i32) {
    %c0_i32 = arith.constant 0 : i32
    %c0_i32_0 = arith.constant 0 : i32
    %c0_i32_1 = arith.constant 0 : i32
    return %c0_i32, %c0_i32_0 : i32, i32
  }
  func.func @transform_5(%arg0: i32, %arg1: i32) -> (i32, i32) {
    %c0_i32 = arith.constant 0 : i32
    %c0_i32_0 = arith.constant 0 : i32
    return %arg0, %c0_i32 : i32, i32
  }
}

</mosaic_0001>

<bundles_post_ra>
// kernel: tpu_custom_call.1
= control target key start
LH: loop header
LB: loop body
LE: loop exit
PB: predicated region body
PF: predicated region fallthrough
CT: control target
= control target key end

     0   :  { %v511_v2 = vmov 0   ;;  %s647_s0 = inlined_call_operand.vmem [shape: f32[16,32], index: 0, kind: input, shape index: {}]   ;;  %s648_s1 = inlined_call_operand.vmem [shape: f32[1,16], index: 1, kind: input, shape index: {}]   ;;  %s649_s2 = inlined_call_operand.vmem [shape: f32[16,1], index: 2, kind: input, shape index: {}]   ;;  %s650_s3 = inlined_call_operand.vmem [shape: s32[1,128], index: 3, kind: input, shape index: {}]   ;;  %s651_s4 = inlined_call_operand.vmem [shape: s32[128,1], index: 4, kind: input, shape index: {}]   ;;  %s652_s5 = inlined_call_operand.hbm [shape: f32[16,32], index: 5, kind: output, shape index: {}]  }
   0x1   :  { %v38_v0 = vld [vmem:[%s651_s4 + $0x10] sm:$0xff]  ;;  %v36_v1 = vld [vmem:[%s651_s4] sm:$0xff]  ;;  %478 = vset.pattern.permute.xlu1 %v511_v2  ;;  %477 = vset.pattern.permute.xlu0 %v511_v2  ;;  %v39_v3 = vld [vmem:[%s651_s4 + $0x18] sm:$0xff] }
   0x2   :  { %78 = vperm.xlu1 %478, %v38_v0   ;;  %72 = vperm.xlu0 %477, %v36_v1   ;;  %v37_v4 = vld [vmem:[%s651_s4 + $0x8] sm:$0xff] }
   0x6   :  { %81 = vperm.xlu1 %478, %v39_v3   ;;  %75 = vperm.xlu0 %477, %v37_v4  }
   0x7   :  { %10 = vsyncpa [#allocation4], 0  ;;  %v41_v5 = vld [vmem:[%s651_s4 + $0x28] sm:$0xff]  ;;  %v40_v6 = vld [vmem:[%s651_s4 + $0x20] sm:$0xff]  ;;  %v512_v7 = vmov 0.0   ;;  %vm513_vm0 = vmmov 0   ;;  %v52_v20 = vlaneseq }
   0x8   :  { %439 = vmatprep.subr.bf16.mxu0 %v512_v7  ;;  %v43_v8 = vld [vmem:[%s651_s4 + $0x38] sm:$0xff]  ;;  %v42_v9 = vld [vmem:[%s651_s4 + $0x30] sm:$0xff]  ;;  %v45_v10 = vld [vmem:[%s651_s4 + $0x48] sm:$0xff]  ;;  %455 = vmatprep.mubr.msk.bf16.mxu0 %vm513_vm0, %v512_v7  ;;  %vm28_vm1 = vcmask 130048   ;;  %v514_v26 = vmov 1.0|1.0  }
   0x9   :  { %v44_v11 = vld [vmem:[%s651_s4 + $0x40] sm:$0xff]  ;;  %v47_v12 = vld [vmem:[%s651_s4 + $0x58] sm:$0xff]  ;;  %v46_v13 = vld [vmem:[%s651_s4 + $0x50] sm:$0xff]  ;;  %29 = vst.msk [vmem:[#allocation2] sm:$0xff] %vm28_vm1, %v512_v7  ;;  %v70_v23 = vand.u32 127, %v52_v20  ;;  %v53_v37 = vshrl.u32 %v52_v20, 7 }
   0xa   :  { %87 = vperm.xlu1 %478, %v41_v5   ;;  %84 = vperm.xlu0 %477, %v40_v6   ;;  %v49_v14 = vld [vmem:[%s651_s4 + $0x68] sm:$0xff]  ;;  %v48_v15 = vld [vmem:[%s651_s4 + $0x60] sm:$0xff]  ;;  %v51_v16 = vld [vmem:[%s651_s4 + $0x78] sm:$0xff]  ;;  %30 = vst.msk [vmem:[#allocation2 + $0x8] sm:$0xff] %vm28_vm1, %v512_v7  ;;  %s515_s8 = smov [#allocation3]  }
   0xb   :  { %v50_v17 = vld [vmem:[%s651_s4 + $0x70] sm:$0xff]  ;;  %v227_v18 = vld [vmem:[%s649_s2 + $0x8] sm:$0xff]  ;;  %v226_v19 = vld [vmem:[%s649_s2] sm:$0xff]  ;;  %v54_v40 = vadd.s32 8, %v53_v37  ;;  %s374_s9 = sshll.u32 %s515_s8, 4  ;;  %s375_s9 = int_to_ptr.vmem [resolvable:$true] %s374_s9 }
   0xc   :  { %v386_v41 = vld [vmem:[%s650_s3] ss:$0 sm:$0xff]  ;;  %p492_p1 = scmp.lt.s32.totalorder %s375_s9, %s375_s9 }
   0xd   :  { %v423_v43 = vld [vmem:[%s648_s1] ss:$0 sm:$0xff] }
   0xe   :  { %93 = vperm.xlu1 %478, %v43_v8   ;;  %90 = vperm.xlu0 %477, %v42_v9  }
  0x10   :  { %v175_v42 = vld [vmem:[#allocation2] sm:$0xff] }
  0x11   :  { %v176_v46 = vld [vmem:[#allocation2 + $0x8] sm:$0xff] }
  0x12   :  { %99 = vperm.xlu1 %478, %v45_v10   ;;  %96 = vperm.xlu0 %477, %v44_v11  }
  0x16   :  { %105 = vperm.xlu1 %478, %v47_v12   ;;  %102 = vperm.xlu0 %477, %v46_v13   ;;  %v283_v13 = vld [vmem:[%s647_s0] sm:$0xff] }
  0x1a   :  { %111 = vperm.xlu1 %478, %v49_v14   ;;  %108 = vperm.xlu0 %477, %v48_v15   ;;  %v284_v14 = vld [vmem:[%s647_s0 + $0x8] sm:$0xff]  ;;  %s487_s0 = scalar_lea.vmem %s375_s9, 256 }
  0x1b   :  { %v466_v15 = vpack.c.bf16 %v284_v14, %v283_v13  ;;  %p488_p0 = scmp.ne.s32.totalorder %s375_s9, %s487_s0  ;;  %p493_p2 = scmp.lt.s32.totalorder %s487_s0, %s487_s0 }
  0x1d   :  { %467 = vmatprep.subr.bf16.mxu1 %v466_v15  ;;  %p494_p3 = por %p493_p2, %p492_p1 }
  0x1e   :  { %117 = vperm.xlu1 %478, %v51_v16   ;;  %114 = vperm.xlu0 %477, %v50_v17  }
  0x1f   :  { %469 = vmatpush3.bf16.msra.mxu1 %v466_v15  ;;  %p495_p4 = pnand %p494_p3, %p488_p0 }
  0x22   :  { %236 = vperm.xlu1 %478, %v227_v18   ;;  %231 = vperm.xlu0 %477, %v226_v19  }
  0x81   :  { %v79_v21 = vpop.permute.xlu1 %78  ;;  %v73_v22 = vpop.permute.xlu0 %72 }
  0x82   :  { %vm119_vm3 = vcmp.eq.s32.totalorder %v70_v23, %v73_v22  ;;  %vm121_vm5 = vcmp.eq.s32.totalorder %v70_v23, %v79_v21 }
  0x85   :  { %v82_v24 = vpop.permute.xlu1 %81  ;;  %v76_v25 = vpop.permute.xlu0 %75 }
  0x86   :  { %vm120_vm2 = vcmp.eq.s32.totalorder %v70_v23, %v76_v25  ;;  %vm122_vm6 = vcmp.eq.s32.totalorder %v70_v23, %v82_v24 }
  0x87   :  { %vm405_vm4 = vmpackc.low %vm120_vm2, %vm119_vm3 }
  0x88   :  { %440 = vmatpush3.bf16.msk.msra.mxu0 %vm405_vm4, %v514_v26  ;;  %vm407_vm7 = vmpackc.low %vm122_vm6, %vm121_vm5 }
  0x89   :  { %v88_v27 = vpop.permute.xlu1 %87  ;;  %v85_v28 = vpop.permute.xlu0 %84  ;;  %441 = vmatprep.subr.bf16.mxu0 %v512_v7 }
  0x8a   :  { %vm124_vm8 = vcmp.eq.s32.totalorder %v70_v23, %v88_v27  ;;  %vm123_vm9 = vcmp.eq.s32.totalorder %v70_v23, %v85_v28 }
  0x8b   :  { %vm409_vm10 = vmpackc.low %vm124_vm8, %vm123_vm9 }
  0x8c   :  { %442 = vmatpush3.bf16.msk.msra.mxu0 %vm407_vm7, %v514_v26 }
  0x8d   :  { %v94_v29 = vpop.permute.xlu1 %93  ;;  %v91_v30 = vpop.permute.xlu0 %90  ;;  %443 = vmatprep.subr.bf16.mxu0 %v512_v7 }
  0x8e   :  { %vm126_vm11 = vcmp.eq.s32.totalorder %v70_v23, %v94_v29  ;;  %vm125_vm12 = vcmp.eq.s32.totalorder %v70_v23, %v91_v30 }
  0x8f   :  { %vm411_vm13 = vmpackc.low %vm126_vm11, %vm125_vm12  ;;  %vm63_vm11 = vcmp.eq.s32.totalorder %v54_v40, %v386_v41 }
  0x90   :  { %444 = vmatpush3.bf16.msk.msra.mxu0 %vm409_vm10, %v514_v26  ;;  %vm62_vm10 = vcmp.eq.s32.totalorder %v53_v37, %v386_v41 }
  0x91   :  { %v100_v31 = vpop.permute.xlu1 %99  ;;  %v97_v32 = vpop.permute.xlu0 %96  ;;  %445 = vmatprep.subr.bf16.mxu0 %v512_v7 }
  0x92   :  { %vm128_vm14 = vcmp.eq.s32.totalorder %v70_v23, %v100_v31  ;;  %vm127_vm15 = vcmp.eq.s32.totalorder %v70_v23, %v97_v32 }
  0x93   :  { %vm413_vm0 = vmpackc.low %vm128_vm14, %vm127_vm15 }
  0x94   :  { %446 = vmatpush3.bf16.msk.msra.mxu0 %vm411_vm13, %v514_v26  ;;  %vm421_vm13 = vmpackc.low %vm63_vm11, %vm62_vm10 }
  0x95   :  { %v106_v33 = vpop.permute.xlu1 %105  ;;  %v103_v34 = vpop.permute.xlu0 %102  ;;  %447 = vmatprep.subr.bf16.mxu0 %v512_v7 }
  0x96   :  { %vm130_vm2 = vcmp.eq.s32.totalorder %v70_v23, %v106_v33  ;;  %vm129_vm3 = vcmp.eq.s32.totalorder %v70_v23, %v103_v34 }
  0x97   :  { %vm415_vm4 = vmpackc.low %vm130_vm2, %vm129_vm3  ;;  %vm366_vm3 = vcmask 261120  }
  0x98   :  { %448 = vmatpush3.bf16.msk.msra.mxu0 %vm413_vm0, %v514_v26 }
  0x99   :  { %v112_v35 = vpop.permute.xlu1 %111  ;;  %v109_v36 = vpop.permute.xlu0 %108  ;;  %449 = vmatprep.subr.bf16.mxu0 %v512_v7 }
  0x9a   :  { %vm132_vm5 = vcmp.eq.s32.totalorder %v70_v23, %v112_v35  ;;  %vm131_vm6 = vcmp.eq.s32.totalorder %v70_v23, %v109_v36 }
  0x9b   :  { %vm417_vm7 = vmpackc.low %vm132_vm5, %vm131_vm6 }
  0x9c   :  { %450 = vmatpush3.bf16.msk.msra.mxu0 %vm415_vm4, %v514_v26 }
  0x9d   :  { %v118_v38 = vpop.permute.xlu1 %117  ;;  %v115_v39 = vpop.permute.xlu0 %114  ;;  %451 = vmatprep.subr.bf16.mxu0 %v512_v7 }
  0x9e   :  { %vm134_vm8 = vcmp.eq.s32.totalorder %v70_v23, %v118_v38  ;;  %vm133_vm9 = vcmp.eq.s32.totalorder %v70_v23, %v115_v39 }
  0x9f   :  { %vm419_vm12 = vmpackc.low %vm134_vm8, %vm133_vm9 }
  0xa0   :  { %452 = vmatpush3.bf16.msk.msra.mxu0 %vm417_vm7, %v514_v26 }
  0xa1   :  { %453 = vmatprep.subr.bf16.mxu0 %v512_v7  ;;  %v232_v44 = vpop.permute.xlu0 %231  ;;  %v237_v49 = vpop.permute.xlu1 %236 }
  0xa2   :  { %v245_v51 = vadd.f32 %v423_v43, %v232_v44  ;;  %v246_v54 = vadd.f32 %v423_v43, %v237_v49 }
  0xa4   :  { %454 = vmatpush3.bf16.msk.msra.mxu0 %vm419_vm12, %v514_v26  ;;  %v249_v55 = vmul.f32 0.2, %v245_v51  ;;  %vm247_vm14 = vcmp.gt.f32.partialorder %v245_v51, 0.0  ;;  %v250_v56 = vmul.f32 0.2, %v246_v54  ;;  %vm248_vm15 = vcmp.gt.f32.partialorder %v246_v54, 0.0 }
  0xa6   :  { %v251_v58 = vsel %vm247_vm14, %v245_v51, %v249_v55  ;;  %v252_v62 = vsel %vm248_vm15, %v246_v54, %v250_v56 }
  0xa7   :  { %456 = vmatmul.mubr.msk.bf16.vlgmr.msra.gmra.mrb[0].mxu0 %vm421_vm13, %v514_v26 }
 0x17a   :  { %v211_v45 = vpop.f32.mrb[0].mxu0 }
 0x17b   :  { %v218_v47 = vadd.f32 %v211_v45, %v175_v42  ;;  %v457_v48 = vpop.f32.mrb[1].mxu0 }
 0x17c   :  { %v214_v50 = vpop.f32.mrb[2].mxu0 }
 0x17d   :  { %221 = vst.msk [vmem:[#allocation2] sm:$0xff] %vm28_vm1, %v218_v47  ;;  %v219_v52 = vadd.f32 %v214_v50, %v176_v46  ;;  %v458_v53 = vpop.f32.mrb[3].mxu0 }
 0x17f   :  { %222 = vst.msk [vmem:[#allocation2 + $0x8] sm:$0xff] %vm28_vm1, %v219_v52 }
 0x184   :  { %v253_v57 = vld [vmem:[#allocation2] sm:$0xff] }
 0x185   :  { %vm255_vm0 = vcmp.gt.f32.partialorder %v253_v57, 0.0 }
 0x186   :  { %v257_v59 = vsel %vm255_vm0, %v251_v58, -1e+30  ;;  %v254_v60 = vld [vmem:[#allocation2 + $0x8] sm:$0xff] }
 0x187   :  { %v259_v61 = vsel %vm28_vm1, %v257_v59, -inf  ;;  %vm256_vm2 = vcmp.gt.f32.partialorder %v254_v60, 0.0 }
 0x188   :  { %260 = vmax.xlane.f32.xlu0 %v259_v61  ;;  %v258_v63 = vsel %vm256_vm2, %v252_v62, -1e+30 }
 0x189   :  { %v262_v0 = vsel %vm28_vm1, %v258_v63, -inf }
 0x18a   :  { %263 = vmax.xlane.f32.xlu1 %v262_v0 }
 0x215   :  { %v261_v1 = vpop.xlane.xlu0 %260 }
 0x216   :  { %v265_v2 = vsub.f32 %v257_v59, %v261_v1 }
 0x217   :  { %v264_v3 = vpop.xlane.xlu1 %263 }
 0x218   :  { %v267_v4 = vmul.f32 1.442695, %v265_v2  ;;  %v266_v5 = vsub.f32 %v258_v63, %v264_v3 }
 0x21a   :  { %479 = vpow2.f32 %v267_v4  ;;  %v269_v6 = vmul.f32 1.442695, %v266_v5 }
 0x21c   :  { %481 = vpow2.f32 %v269_v6 }
 0x224   :  { %v480_v7 = vpop.eup %479 }
 0x225   :  { %v271_v8 = vmul.f32 %v480_v7, %v253_v57 }
 0x226   :  { %v482_v9 = vpop.eup %481 }
 0x227   :  { %v273_v10 = vsel %vm28_vm1, %v271_v8, 0.0  ;;  %v272_v11 = vmul.f32 %v482_v9, %v254_v60 }
 0x228   :  { %274 = vadd.xlane.f32.xlu0 %v273_v10 }
 0x229   :  { %v276_v12 = vsel %vm28_vm1, %v272_v11, 0.0 }
 0x22c   :  { %277 = vadd.xlane.f32.xlu0 %v276_v12 }
 0x2b5   :  { %v275_v16 = vpop.xlane.xlu0 %274 }
 0x2b6   :  { %483 = vrcp.f32 %v275_v16 }
 0x2b9   :  { %v278_v17 = vpop.xlane.xlu0 %277 }
 0x2ba   :  { %485 = vrcp.f32 %v278_v17 }
 0x2c0   :  { %v484_v18 = vpop.eup %483 }
 0x2c1   :  { %v281_v19 = vmul.f32 %v484_v18, %v271_v8 }
 0x2c3   :  { %463 = vmatprep.mubr.msk.f32.mxu1 %vm28_vm1, %v281_v19 }
 0x2c4   :  { %v486_v20 = vpop.eup %485 }
 0x2c5   :  { %v282_v21 = vmul.f32 %v486_v20, %v272_v11 }
 0x2c7   :  { %464 = vmatmul.mubr.msk.f32.vlgmr.msra.gmra.mrb[0].mxu1 %vm28_vm1, %v282_v21 }
 0x39a   :  { %v465_v22 = vpop.f32.mrb[0].mxu1 }
 0x39b   :  { %368 = vst.msk [vmem:[#allocation3 + $0x8] sm:$0xff] %vm366_vm3, %v465_v22  ;;  %v357_v23 = vpop.f32.mrb[1].mxu1 }
 0x39c   :  { %367 = vst.msk [vmem:[#allocation3] sm:$0xff] %vm366_vm3, %v357_v23 }
 0x39d   :  { %498 = shalt.err (!%p495_p4)
}
 0x39e   :  { %s499_s12 = scalar_lea.hbm %s652_s5, 256 }
 0x39f   :  { %p500_p5 = scmp.ne.s32.totalorder %s652_s5, %s499_s12  ;;  %p503_p6 = scmp.lt.u32.totalorder %s499_s12, %s652_s5 }
 0x3a1   :  { %p505_p7 = pnand %p503_p6, %p500_p5 }
 0x3a3   :  { %508 = shalt.err (!%p505_p7)
}
 0x3a4   :  { %s516_s17 = smov 128   ;;  %s517_s18 = smov 8  }
 0x3a5   :  { %380 = dma.vmem_to_hbm [thread:$0]  %s375_s9, 256, %s652_s5, [#allocation4], %s516_s17, %s516_s17, %s517_s18  }
 0x3a6   :  { %509 = dma.done.wait [#allocation4], 256  }
 0x3a7   :  { %510 = vsyncadd [#allocation4], 4294967040 }
 0x3a8   :  { %384 = vsyncpa [#allocation4], 1 }

</bundles_post_ra>
